<compile_context>
chip_gen: v7x
topology: tpu7x:2x2x1
jax: 0.10.0
libtpu: 0.0.40
codegen_flags: <defaults>
</compile_context>

<pallas_src>
import functools

import jax
import jax.numpy as jnp
from jax.experimental import pallas as pl
from jax.experimental.pallas import tpu as pltpu


# ---------------------------------------------------------------------------
# Generation-aware sizing.
# ---------------------------------------------------------------------------
def _tpu_vmem_capacity_bytes():
    try:
        info = pltpu.get_tpu_info()
        cap = getattr(info, "vmem_capacity_bytes", None)
        if cap:
            return int(cap)
    except Exception:
        pass
    return 64 * 1024 * 1024  # conservative default: v7x per-TensorCore VMEM


def _gen_params():
    vmem = _tpu_vmem_capacity_bytes()
    if vmem >= 100 * 1024 * 1024:  # v5e / v6e: 128 MiB physical VMEM
        return dict(
            whole_slab_fp32_limit=12 * 1024 * 1024,
            whole_slab_vmem_limit=100 * 1024 * 1024,
            tile_budget_bytes=4 * 1024 * 1024,
            tiled_vmem_limit=64 * 1024 * 1024,
        )
    return dict(  # v7x: 64 MiB per TensorCore
        whole_slab_fp32_limit=6 * 1024 * 1024,
        whole_slab_vmem_limit=52 * 1024 * 1024,
        tile_budget_bytes=3 * 1024 * 1024,
        tiled_vmem_limit=40 * 1024 * 1024,
    )


# ---------------------------------------------------------------------------
# Whole-slab fused kernel (small/medium C*T): 1 read + 1 write of x.
# ---------------------------------------------------------------------------
def _gcln_whole_slab_kernel(x_ref, gamma_ref, beta_ref, o_ref, *, eps, count):
    x = x_ref[...].astype(jnp.float32)          # (1, C, T)
    inv_count = 1.0 / count
    s = jnp.sum(x)
    sq = jnp.sum(x * x)                         # fused sum / sum-of-squares sweep
    del x                                       # don't keep fp32 slab live across apply
    mean = s * inv_count
    var = jnp.maximum(sq * inv_count - mean * mean, 0.0)
    inv = jax.lax.rsqrt(var + eps)
    gamma = gamma_ref[...].astype(jnp.float32)  # (C, 1)
    beta = beta_ref[...].astype(jnp.float32)    # (C, 1)
    scale = gamma * inv                         # per-channel scale, computed once
    shift = beta - mean * scale                 # per-channel shift, computed once
    x2 = x_ref[...].astype(jnp.float32)         # re-read: cheaper than keeping fp32 slab
    o_ref[...] = (x2 * scale[None] + shift[None]).astype(o_ref.dtype)


# ---------------------------------------------------------------------------
# Tiled two-pass kernels (large C*T).
# ---------------------------------------------------------------------------
def _gcln_stats_kernel(x_ref, gamma_ref, beta_ref, ss_ref, *scratch, eps, count,
                       t_total, t_tile, chunk_lanes, n_chunks, needs_mask,
                       single_tile):
    def finalize(s, sq):
        inv_count = 1.0 / count
        mean = s * inv_count
        # NOTE: E[x^2] - mean^2 in fp32; vreg-shaped partial accumulation below keeps
        # rounding drift small for large C*T.
        var = jnp.maximum(sq * inv_count - mean * mean, 0.0)
        inv = jax.lax.rsqrt(var + eps)
        gamma = gamma_ref[...].astype(jnp.float32)   # (C, 1)
        beta = beta_ref[...].astype(jnp.float32)     # (C, 1)
        scale = gamma * inv                          # (C, 1)
        shift = beta - mean * scale                  # (C, 1)
        ss_ref[...] = jnp.concatenate([scale, shift], axis=-1)[None]  # (1, C, 2)

    if single_tile:
        # Only one T tile: reduce the whole tile directly, no cross-tile state.
        x = x_ref[0].astype(jnp.float32)             # (C, T)
        finalize(jnp.sum(x), jnp.sum(x * x))
        return

    sum_acc, sq_acc = scratch                        # (C, chunk_lanes) fp32 each
    t_idx = pl.program_id(1)
    last = pl.num_programs(1) - 1

    @pl.when(t_idx == 0)
    def _():
        sum_acc[...] = jnp.zeros_like(sum_acc)
        sq_acc[...] = jnp.zeros_like(sq_acc)

    def add_chunk(c, base, masked):
        if masked:
            col = jax.lax.broadcasted_iota(jnp.int32, c.shape, 1) + base
            c = jnp.where(col < t_total, c, 0.0)
        # Pure elementwise vreg adds (VPU); no per-tile XLU collapse.
        sum_acc[...] += c
        sq_acc[...] += c * c

    def accumulate(masked):
        t_base = t_idx * t_tile
        if n_chunks <= 64:
            for i in range(n_chunks):                # statically unrolled, static offsets
                c = x_ref[0, :, i * chunk_lanes:(i + 1) * chunk_lanes]
                add_chunk(c.astype(jnp.float32), t_base + i * chunk_lanes, masked)
        else:
            def body(i, carry):
                off = pl.multiple_of(i * chunk_lanes, chunk_lanes)
                c = x_ref[0, :, pl.ds(off, chunk_lanes)]
                add_chunk(c.astype(jnp.float32), t_base + off, masked)
                return carry
            jax.lax.fori_loop(0, n_chunks, body, 0)

    if needs_mask:
        # Only the genuinely-last T tile pays the iota/compare/select cost.
        @pl.when(t_idx < last)
        def _():
            accumulate(False)

        @pl.when(t_idx == last)
        def _():
            accumulate(True)
    else:
        accumulate(False)

    @pl.when(t_idx == last)
    def _():
        # Single cross-lane/sublane (XLU) collapse per batch element.
        finalize(jnp.sum(sum_acc[...]), jnp.sum(sq_acc[...]))


def _gcln_apply_kernel(x_ref, ss_ref, o_ref):
    ss = ss_ref[0]                                   # (C, 2) fp32
    scale = ss[:, 0:1][None]                         # (1, C, 1)
    shift = ss[:, 1:2][None]                         # (1, C, 1)
    x = x_ref[...].astype(jnp.float32)               # (1, C, tT)
    o_ref[...] = (x * scale + shift).astype(o_ref.dtype)   # 2 ops/elem, lane-dense store


def _plan_tiles(C, T, itemsize, budget_bytes, t_tile=None):
    """Returns (t_tile, chunk_lanes, num_t, single_tile, needs_mask, n_chunks)."""
    if t_tile is None:
        lanes = (budget_bytes // max(1, C * itemsize)) // 128 * 128
        lanes = max(128, int(lanes))
        t_tile = T if (T <= 512 or lanes >= T) else lanes
    t_tile = int(min(t_tile, T))
    if t_tile < T:
        t_tile = max(128, (t_tile // 128) * 128)     # lane-dense tiles when tiling T
    num_t = -(-T // t_tile)
    if num_t == 1:
        return T, 0, 1, True, False, 0
    # Chunk size: ~64K fp32 elements per accumulation step (keeps loop overhead tiny,
    # accumulator a few hundred KiB).
    target_chunk_elems = 64 * 1024
    chunk_lanes = max(128, (target_chunk_elems // max(1, C)) // 128 * 128)
    chunk_lanes = min(chunk_lanes, t_tile)
    while t_tile % chunk_lanes != 0:
        chunk_lanes -= 128
    needs_mask = (T % t_tile) != 0
    n_chunks = t_tile // chunk_lanes
    return t_tile, chunk_lanes, num_t, False, needs_mask, n_chunks


# ---------------------------------------------------------------------------
# Wrapper
# ---------------------------------------------------------------------------
def global_channel_layer_norm(x, gamma=None, beta=None, *, eps=1e-5,
                              t_tile=None, force_tiled=False):
    """x: (N, C, T); gamma/beta: (C, 1) or None (=> no affine). Returns (N, C, T)."""
    N, C, T = x.shape
    if gamma is None:
        gamma = jnp.ones((C, 1), dtype=x.dtype)
    if beta is None:
        beta = jnp.zeros((C, 1), dtype=x.dtype)
    count = float(C * T)
    params = _gen_params()

    slab_fp32_bytes = C * T * 4
    if (not force_tiled) and slab_fp32_bytes <= params["whole_slab_fp32_limit"]:
        kernel = functools.partial(_gcln_whole_slab_kernel, eps=eps, count=count)
        return pl.pallas_call(
            kernel,
            out_shape=jax.ShapeDtypeStruct((N, C, T), x.dtype),
            grid_spec=pltpu.PrefetchScalarGridSpec(
                num_scalar_prefetch=0,
                grid=(N,),
                in_specs=[
                    pl.BlockSpec((1, C, T), lambda n: (n, 0, 0)),
                    pl.BlockSpec((C, 1), lambda n: (0, 0)),
                    pl.BlockSpec((C, 1), lambda n: (0, 0)),
                ],
                out_specs=pl.BlockSpec((1, C, T), lambda n: (n, 0, 0)),
            ),
            compiler_params=pltpu.CompilerParams(
                dimension_semantics=("parallel",),
                vmem_limit_bytes=params["whole_slab_vmem_limit"],
            ),
        )(x, gamma, beta)

    # ---- Tiled two-pass path ----
    itemsize = jnp.dtype(x.dtype).itemsize
    (t_tile, chunk_lanes, num_t, single_tile, needs_mask, n_chunks) = _plan_tiles(
        C, T, itemsize, params["tile_budget_bytes"], t_tile)

    stats_kernel = functools.partial(
        _gcln_stats_kernel, eps=eps, count=count, t_total=T, t_tile=t_tile,
        chunk_lanes=chunk_lanes, n_chunks=n_chunks, needs_mask=needs_mask,
        single_tile=single_tile)

    scratch_shapes = [] if single_tile else [
        pltpu.VMEM((C, chunk_lanes), jnp.float32),   # running per-lane sum
        pltpu.VMEM((C, chunk_lanes), jnp.float32),   # running per-lane sum of squares
    ]

    # Pass A: per-batch packed (scale | shift) in one (N, C, 2) fp32 array.
    ss = pl.pallas_call(
        stats_kernel,
        out_shape=jax.ShapeDtypeStruct((N, C, 2), jnp.float32),
        grid_spec=pltpu.PrefetchScalarGridSpec(
            num_scalar_prefetch=0,
            grid=(N, num_t),
            in_specs=[
                pl.BlockSpec((1, C, t_tile), lambda n, t: (n, 0, t)),
                pl.BlockSpec((C, 1), lambda n, t: (0, 0)),   # constant index -> no re-DMA
                pl.BlockSpec((C, 1), lambda n, t: (0, 0)),
            ],
            out_specs=pl.BlockSpec((1, C, 2), lambda n, t: (n, 0, 0)),  # resident over t
            scratch_shapes=scratch_shapes,
        ),
        compiler_params=pltpu.CompilerParams(
            dimension_semantics=("parallel", "arbitrary"),   # reduction axis last
            vmem_limit_bytes=params["tiled_vmem_limit"],
        ),
    )(x, gamma, beta)

    # Pass B: elementwise apply, both axes parallel (v7x 2-TC split of N x T_tiles).
    return pl.pallas_call(
        _gcln_apply_kernel,
        out_shape=jax.ShapeDtypeStruct((N, C, T), x.dtype),
        grid_spec=pltpu.PrefetchScalarGridSpec(
            num_scalar_prefetch=0,
            grid=(N, num_t),
            in_specs=[
                pl.BlockSpec((1, C, t_tile), lambda n, t: (n, 0, t)),
                pl.BlockSpec((1, C, 2), lambda n, t: (n, 0, 0)),
            ],
            out_specs=pl.BlockSpec((1, C, t_tile), lambda n, t: (n, 0, t)),
        ),
        compiler_params=pltpu.CompilerParams(
            dimension_semantics=("parallel", "parallel"),
            vmem_limit_bytes=params["tiled_vmem_limit"],
        ),
    )(x, ss)


def _reference(x, gamma, beta, eps=1e-5):
    mean = jnp.mean(x, axis=(1, 2), keepdims=True)
    var = jnp.mean((x - mean) ** 2, axis=(1, 2), keepdims=True)
    return gamma[None] * (x - mean) / jnp.sqrt(var + eps) + beta[None]


if __name__ == "__main__":
    key = jax.random.PRNGKey(0)
    k1, k2, k3, k4 = jax.random.split(key, 4)

    # 1) Whole-slab fused fast path (module-default affine params).
    N, C, T = 2, 4, 16
    x = jax.random.normal(k1, (N, C, T), dtype=jnp.float32)
    gamma = jnp.ones((C, 1), dtype=jnp.float32)    # nn.Parameter(th.ones(dim, 1))
    beta = jnp.zeros((C, 1), dtype=jnp.float32)    # nn.Parameter(th.zeros(dim, 1))
    out = jax.block_until_ready(global_channel_layer_norm(x, gamma, beta, eps=1e-5))
    ref = _reference(x, gamma, beta, 1e-5)
    assert jnp.allclose(out, ref, atol=1e-5, rtol=1e-5), "whole-slab path mismatch"

    # 2) Tiled path (forced): 3 T tiles with a masked partial last tile.
    N2, C2, T2 = 2, 8, 300
    x2 = jax.random.normal(k2, (N2, C2, T2), dtype=jnp.float32)
    gamma2 = 0.5 + jax.random.uniform(k3, (C2, 1), dtype=jnp.float32)
    beta2 = 0.1 * jax.random.normal(k4, (C2, 1), dtype=jnp.float32)
    out2 = jax.block_until_ready(global_channel_layer_norm(
        x2, gamma2, beta2, eps=1e-5, force_tiled=True, t_tile=128))
    ref2 = _reference(x2, gamma2, beta2, 1e-5)
    assert jnp.allclose(out2, ref2, atol=1e-4, rtol=1e-4), "tiled path mismatch"

    # 3) Tiled path (forced): multi-chunk vreg accumulation + masked last tile.
    N3, C3, T3 = 1, 512, 2000
    x3 = jax.random.normal(k3, (N3, C3, T3), dtype=jnp.float32)
    gamma3 = 0.5 + jax.random.uniform(k4, (C3, 1), dtype=jnp.float32)
    beta3 = 0.1 * jax.random.normal(k1, (C3, 1), dtype=jnp.float32)
    out3 = jax.block_until_ready(global_channel_layer_norm(
        x3, gamma3, beta3, eps=1e-5, force_tiled=True, t_tile=1024))
    ref3 = _reference(x3, gamma3, beta3, 1e-5)
    assert jnp.allclose(out3, ref3, atol=1e-3, rtol=1e-3), "multi-chunk tiled mismatch"

    # 4) Tiled path (forced), single-tile specialization; no-affine (identity gamma/beta).
    N4, C4, T4 = 2, 16, 200
    x4 = jax.random.normal(k4, (N4, C4, T4), dtype=jnp.float32)
    out4 = jax.block_until_ready(global_channel_layer_norm(
        x4, None, None, eps=1e-5, force_tiled=True))
    ref4 = _reference(x4, jnp.ones((C4, 1), jnp.float32),
                      jnp.zeros((C4, 1), jnp.float32), 1e-5)
    assert jnp.allclose(out4, ref4, atol=1e-5, rtol=1e-5), "single-tile tiled mismatch"

    print("KERNEL_OK")
</pallas_src>

<mosaic_0001>
module attributes {stable_mosaic.version = 11 : i64} {
  func.func @_gcln_whole_slab_kernel(%arg0: i32, %arg1: memref<1x4x16xf32, #tpu.memory_space<vmem>>, %arg2: memref<4x1xf32, #tpu.memory_space<vmem>>, %arg3: memref<4x1xf32, #tpu.memory_space<vmem>>, %arg4: memref<1x4x16xf32, #tpu.memory_space<vmem>>) attributes {dimension_semantics = [#tpu.dimension_semantics<parallel>], iteration_bounds = array<i64: 2>, scalar_prefetch = 0 : i64, scratch_operands = 0 : i64, tpu.core_type = #tpu.core_type<tc>, window_params = [{transform_indices = @transform_0, window_bounds = array<i64: 1, 4, 16>}, {pipeline_mode = #tpu.pipeline_mode<synchronous>, transform_indices = @transform_1, window_bounds = array<i64: 4, 1>}, {pipeline_mode = #tpu.pipeline_mode<synchronous>, transform_indices = @transform_2, window_bounds = array<i64: 4, 1>}, {transform_indices = @transform_3, window_bounds = array<i64: 1, 4, 16>}]} {
    %c0 = arith.constant 0 : index
    %c0_0 = arith.constant 0 : index
    %c0_1 = arith.constant 0 : index
    %0 = vector.load %arg1[%c0, %c0_0, %c0_1] : memref<1x4x16xf32, #tpu.memory_space<vmem>>, vector<1x4x16xf32>
    %1 = vector.shape_cast %0 : vector<1x4x16xf32> to vector<1x1x4x16xf32>
    %cst = arith.constant dense<0.000000e+00> : vector<1xf32>
    %2 = vector.multi_reduction <add>, %1, %cst [1, 2, 3] : vector<1x1x4x16xf32> to vector<1xf32>
    %3 = vector.shape_cast %2 : vector<1xf32> to vector<1x1x1x1xf32>
    %4 = vector.extract %3[0, 0, 0, 0] : f32 from vector<1x1x1x1xf32>
    %5 = arith.mulf %0, %0 : vector<1x4x16xf32>
    %6 = vector.shape_cast %5 : vector<1x4x16xf32> to vector<1x1x4x16xf32>
    %cst_2 = arith.constant dense<0.000000e+00> : vector<1xf32>
    %7 = vector.multi_reduction <add>, %6, %cst_2 [1, 2, 3] : vector<1x1x4x16xf32> to vector<1xf32>
    %8 = vector.shape_cast %7 : vector<1xf32> to vector<1x1x1x1xf32>
    %9 = vector.extract %8[0, 0, 0, 0] : f32 from vector<1x1x1x1xf32>
    %cst_3 = arith.constant 1.562500e-02 : f32
    %10 = arith.mulf %4, %cst_3 : f32
    %cst_4 = arith.constant 1.562500e-02 : f32
    %11 = arith.mulf %9, %cst_4 : f32
    %12 = arith.mulf %10, %10 : f32
    %13 = arith.subf %11, %12 : f32
    %cst_5 = arith.constant 0.000000e+00 : f32
    %14 = arith.maximumf %13, %cst_5 : f32
    %cst_6 = arith.constant 9.99999974E-6 : f32
    %15 = arith.addf %14, %cst_6 : f32
    %16 = math.rsqrt %15 : f32
    %c0_7 = arith.constant 0 : index
    %c0_8 = arith.constant 0 : index
    %17 = vector.load %arg2[%c0_7, %c0_8] : memref<4x1xf32, #tpu.memory_space<vmem>>, vector<4x1xf32>
    %c0_9 = arith.constant 0 : index
    %c0_10 = arith.constant 0 : index
    %18 = vector.load %arg3[%c0_9, %c0_10] : memref<4x1xf32, #tpu.memory_space<vmem>>, vector<4x1xf32>
    %19 = vector.broadcast %16 : f32 to vector<4x1xf32>
    %20 = arith.mulf %17, %19 : vector<4x1xf32>
    %21 = vector.broadcast %10 : f32 to vector<4x1xf32>
    %22 = arith.mulf %21, %20 : vector<4x1xf32>
    %23 = arith.subf %18, %22 : vector<4x1xf32>
    %c0_11 = arith.constant 0 : index
    %c0_12 = arith.constant 0 : index
    %c0_13 = arith.constant 0 : index
    %24 = vector.load %arg1[%c0_11, %c0_12, %c0_13] : memref<1x4x16xf32, #tpu.memory_space<vmem>>, vector<1x4x16xf32>
    %25 = vector.shape_cast %20 : vector<4x1xf32> to vector<1x4x1xf32>
    %26 = vector.broadcast %25 : vector<1x4x1xf32> to vector<1x4x16xf32>
    %27 = arith.mulf %24, %26 : vector<1x4x16xf32>
    %28 = vector.shape_cast %23 : vector<4x1xf32> to vector<1x4x1xf32>
    %29 = vector.broadcast %28 : vector<1x4x1xf32> to vector<1x4x16xf32>
    %30 = arith.addf %27, %29 : vector<1x4x16xf32>
    %c0_14 = arith.constant 0 : index
    %c0_15 = arith.constant 0 : index
    %c0_16 = arith.constant 0 : index
    %31 = vector.load %arg4[%c0_14, %c0_15, %c0_16] : memref<1x4x16xf32, #tpu.memory_space<vmem>>, vector<1x4x16xf32>
    tpu.vector_store %arg4[%c0_14, %c0_15, %c0_16], %30 {strides = array<i32>} : memref<1x4x16xf32, #tpu.memory_space<vmem>>, vector<1x4x16xf32>,
    return
  }
  func.func @transform_0(%arg0: i32) -> (i32, i32, i32) {
    %c0_i32 = arith.constant 0 : i32
    %c0_i32_0 = arith.constant 0 : i32
    %c0_i32_1 = arith.constant 0 : i32
    return %arg0, %c0_i32, %c0_i32_0 : i32, i32, i32
  }
  func.func @transform_1(%arg0: i32) -> (i32, i32) {
    %c0_i32 = arith.constant 0 : i32
    %c0_i32_0 = arith.constant 0 : i32
    %c0_i32_1 = arith.constant 0 : i32
    return %c0_i32, %c0_i32_0 : i32, i32
  }
  func.func @transform_2(%arg0: i32) -> (i32, i32) {
    %c0_i32 = arith.constant 0 : i32
    %c0_i32_0 = arith.constant 0 : i32
    %c0_i32_1 = arith.constant 0 : i32
    return %c0_i32, %c0_i32_0 : i32, i32
  }
  func.func @transform_3(%arg0: i32) -> (i32, i32, i32) {
    %c0_i32 = arith.constant 0 : i32
    %c0_i32_0 = arith.constant 0 : i32
    %c0_i32_1 = arith.constant 0 : i32
    return %arg0, %c0_i32, %c0_i32_0 : i32, i32, i32
  }
}

</mosaic_0001>

<bundles_post_ra>
// kernel: tpu_custom_call.1
= control target key start
LH: loop header
LB: loop body
LE: loop exit
PB: predicated region body
PF: predicated region fallthrough
CT: control target
= control target key end

     0   :  { %8 = vsyncpa [#allocation3], 0  ;;  %s548_s0 = inlined_call_operand.vmem [shape: f32[2,4,16], index: 0, kind: input, shape index: {}]   ;;  %s549_s1 = inlined_call_operand.vmem [shape: f32[4,1], index: 1, kind: input, shape index: {}]   ;;  %s550_s2 = inlined_call_operand.vmem [shape: f32[4,1], index: 2, kind: input, shape index: {}]   ;;  %s551_s3 = inlined_call_operand.hbm [shape: f32[2,4,16], index: 3, kind: output, shape index: {}]  }
   0x1   :  { %10 = vsyncpa [#allocation3 + $0x1], 0  ;;  %s439_s12 = smov 0   ;;  %s441_s13 = smov 0  }
   0x2   :  { %s443_s14 = smov 0   ;;  %s445_s15 = smov 0  }
   0x3 LB: > { %s460_s16 = sadd.s32 4294967295, %s414_s15   ;;  %s291_s17 = sadd.s32 4294967294, %s414_s15   ;;  %s414_s15 = sphi %s445_s15, %s557_s15   ;;  %s410_s14 = sphi %s443_s14, %s556_s14   ;;  %s406_s13 = sphi %s441_s13, %s555_s13   ;;  %s402_s12 = sphi %s439_s12, %s554_s12  }
   0x4   : > { %s464_s18 = sadd.s32 1, %s414_s15   ;;  %s91_s19 = sadd.s32 1, %s410_s14 }
   0x5   : > { %s88_s20 = ssub.s32 %s414_s15, %s464_s18  ;;  %p101_p0 = scmp.ne.s32.totalorder %s410_s14, %s406_s13 }
   0x6   : > { %p89_p1 = scmp.eq.s32.totalorder %s88_s20, 0  ;;  %p102_p2 = scmp.eq.s32.totalorder %s460_s16, 1 }
   0x7   : > { %p107_p3 = scmp.ne.s32.totalorder %s406_s13, %s402_s12  ;;  %p108_p4 = scmp.eq.s32.totalorder %s291_s17, 1 }
   0x8   : > { %s475_s21 = scalar_select %p89_p1, %s410_s14, %s91_s19  }
   0x9   : > { %p477_p5 = por %p102_p2, %p101_p0  ;;  %p481_p6 = por %p108_p4, %p107_p3 }
   0xa   : > { %p294_p7 = scmp.ge.s32.totalorder %s414_s15, 1  ;;  %p139_p8 = scmp.lt.s32.totalorder %s414_s15, 3 }
   0xc   : > { %p140_p9 = pnand %p294_p7, %p139_p8 }
   0xd   : > { %p162_p10 = scmp.lt.s32.totalorder (!%p140_p9), %s460_s16, 1  ;;  %vm167_vm0 = vcmask (!%p140_p9), 125952   ;;  %v416_v14 = vmov (!%p140_p9), 0   ;;  %s417_s8 = smov (!%p140_p9), 0.0   ;;  %v198_v21 = vld [vmem:[%s549_s1] sm:$0xf] (!%p140_p9) }
   0xe   : > { %143 = sbr.rel (%p140_p9) target bundleno = 455 (0x1c7), region = 32  ;;  %348 = vset.pattern.permute.xlu1 (!%p140_p9), %v416_v14  ;;  %349 = vset.pattern.permute.xlu0 (!%p140_p9), %v416_v14  ;;  %v199_v25 = vld [vmem:[%s550_s2] sm:$0xf] (!%p140_p9)  ;;  %s298_s27 = sshll.u32 (!%p140_p9), %s460_s16, 6 }
  0x15   : > { %s163_s24 = scalar_select %p162_p10, %s460_s16, 1 }
  0x16   : > { %s418_s16 = smov [#allocation2]  }
  0x17   : > { %s296_s25 = sshll.u32 %s163_s24, 2 }
  0x18   : > { %s165_s28 = scalar_lea.vmem %s548_s0, %s296_s25  ;;  %s159_s25 = sand.u32 1, %s406_s13  }
  0x19   : > { %v166_v0 = vld [vmem:[%s165_s28] sm:$0xf]  ;;  %s295_s26 = sshll.u32 %s159_s25, 2 }
  0x1a   : > { %v168_v1 = vsel %vm167_vm0, %v166_v0, 0.0  ;;  %v178_v2 = vmul.f32 %v166_v0, %v166_v0  ;;  %s161_s28 = scalar_lea.vmem [#allocation2], %s295_s26 }
  0x1b   : > { %169 = vadd.xlane.f32.xlu0 %v168_v1 }
  0x1c   : > { %v179_v3 = vsel %vm167_vm0, %v178_v2, 0.0 }
  0x1f   : > { %180 = vadd.xlane.f32.xlu0 %v179_v3 }
  0xa8   : > { %v170_v4 = vpop.xlane.xlu0 %169 }
  0xa9   : > { %v171_v5 = vrot.slane %v170_v4, 4 }
  0xab   : > { %v172_v6 = vadd.f32 %v171_v5, %v170_v4 }
  0xac   : > { %v181_v7 = vpop.xlane.xlu0 %180 }
  0xad   : > { %v173_v8 = vrot.slane %v172_v6, 2  ;;  %v182_v9 = vrot.slane %v181_v7, 4 }
  0xaf   : > { %v183_v10 = vadd.f32 %v182_v9, %v181_v7  ;;  %v174_v11 = vadd.f32 %v173_v8, %v172_v6 }
  0xb1   : > { %v184_v12 = vrot.slane %v183_v10, 2  ;;  %v175_v13 = vrot.slane %v174_v11, 1 }
  0xb3   : > { %v185_v15 = vadd.f32 %v184_v12, %v183_v10  ;;  %v176_v16 = vadd.f32 %v175_v13, %v174_v11 }
  0xb5   : > { %301 = vpush %v176_v16  ;;  %v186_v17 = vrot.slane %v185_v15, 1 }
  0xb7   : > { %v187_v18 = vadd.f32 %v186_v17, %v185_v15 }
  0xb9   : > { %303 = vpush %v187_v18 }
  0xe6   : > { %s302_s29 = spop %301 }
  0xe7   : > { %s189_s30 = smul.f32 0.015625, %s302_s29  ;;  %s232_s29 = sshll.u32 %s161_s28, 4  ;;  %s507_s29 = int_to_ptr.vmem [resolvable:$true] %s232_s29 }
  0xe9   : > { %s191_s4 = smul.f32 %s189_s30, %s189_s30  ;;  %v202_v24 = vstv %s189_s30 }
  0xea   : > { %s304_s5 = spop %303 }
  0xeb   : > { %s190_s6 = smul.f32 0.015625, %s304_s5  ;;  %s505_s5 = scalar_lea.hbm %s551_s3, %s298_s27 }
  0xed   : > { %s192_s7 = ssub.f32 %s190_s6, %s191_s4  ;;  %s219_s6 = scalar_lea.sflag [#allocation3], %s159_s25 }
  0xef   : > { %s193_s9 = smax.f32 %s417_s8, %s192_s7  ;;  %s352_s7 = scalar_lea.vmem %s507_s29, 64 }
  0xf0   : > { %s194_s10 = sadd.f32 1e-05, %s193_s9  ;;  %p353_p11 = scmp.ne.s32.totalorder %s507_s29, %s352_s7 }
  0xf1   : > { %s356_s8 = sshll.u32 %s418_s16, 4  ;;  %s357_s8 = int_to_ptr.vmem [resolvable:$false] %s356_s8 }
  0xf2   : > { %v195_v19 = vstv %s194_s10  ;;  %p354_p12 = pnand %p353_p11, %p477_p5  ;;  %s358_s9 = scalar_lea.vmem %s357_s8, 128 }
  0xf3   : > { %350 = vrsqrt.f32 %v195_v19  ;;  %p359_p0 = scmp.lt.s32.totalorder %s507_s29, %s357_s8  ;;  %p360_p1 = scmp.lt.s32.totalorder %s358_s9, %s352_s7 }
  0xf4   : > { %p355_p13 = pneg %p354_p12 }
  0xf5   : > { %p361_p2 = por %p360_p1, %p359_p0 }
  0xf7   : > { %p362_p3 = pnand %p361_p2, %p355_p13 }
  0xfd   : > { %v351_v20 = vpop.eup %350 }
  0xfe   : > { %305 = vpush %v351_v20 }
 0x12f   : > { %s306_s19 = spop %305 }
 0x130   : > { %v200_v22 = vstv %s306_s19 }
 0x131   : > { %v201_v23 = vmul.f32 %v200_v22, %v198_v21 }
 0x133   : > { %v203_v26 = vmul.f32 %v202_v24, %v201_v23  ;;  %207 = vperm.xlu1 %348, %v201_v23  }
 0x135   : > { %v204_v27 = vsub.f32 %v199_v25, %v203_v26 }
 0x137   : > { %213 = vperm.xlu1 %348, %v204_v27  }
 0x1b2   : > { %v208_v28 = vpop.permute.xlu1 %207 }
 0x1b3   : > { %v210_v29 = vmul.f32 %v208_v28, %v166_v0 }
 0x1b6   : > { %v214_v30 = vpop.permute.xlu1 %213 }
 0x1b7   : > { %v216_v31 = vadd.f32 %v214_v30, %v210_v29 }
 0x1b9   : > { %217 = vst.msk [vmem:[%s161_s28] sm:$0xf] %vm167_vm0, %v216_v31 }
 0x1ba   : > { %365 = shalt.err (!%p362_p3)
}
 0x1bb   : > { %s366_s10 = scalar_lea.hbm %s505_s5, 64  ;;  %s370_s19 = scalar_lea.hbm %s551_s3, 128 }
 0x1bc   : > { %p367_p4 = scmp.ne.s32.totalorder %s505_s5, %s366_s10  ;;  %p371_p9 = scmp.lt.u32.totalorder %s505_s5, %s551_s3 }
 0x1bd   : > { %p372_p10 = scmp.lt.u32.totalorder %s370_s19, %s366_s10  ;;  %p374_p12 = scmp.lt.u32.totalorder %s366_s10, %s505_s5 }
 0x1be   : > { %p368_p7 = pnand %p367_p4, %p477_p5 }
 0x1bf   : > { %p373_p11 = por %p372_p10, %p371_p9 }
 0x1c0   : > { %p369_p8 = pneg %p368_p7 }
 0x1c1   : > { %p375_p13 = por %p374_p12, %p373_p11 }
 0x1c3   : > { %p376_p0 = pnand %p375_p13, %p369_p8 }
 0x1c5   : > { %379 = shalt.err (!%p376_p0)
}
 0x1c6   : > { %307 = dma.vmem_to_hbm [thread:$0]  (%p477_p5), %s507_s29, 64, %s505_s5, %s219_s6  }
 0x1c7 PF: > { %p313_p1 = scmp.ge.s32.totalorder %s414_s15, 2  ;;  %s244_s25 = sand.u32 1, %s402_s12  }
 0x1c8   : > { %s245_s26 = scalar_lea.sflag [#allocation3], %s244_s25 }
 0x1c9   : > { %p310_p2 = pnand %p313_p1, %p481_p6 }
 0x1cb   : > { %397 = dma.done.wait (!%p310_p2), %s245_s26, 64  }
 0x1cc   : > { %399 = vsyncadd (!%p310_p2), %s245_s26, 4294967232  ;;  %p13_p3 = scmp.ge.s32.totalorder %s464_s18, 4   ;;  %s554_s12 = smov %s406_s13 }
 0x1cd   : > { %s555_s13 = smov %s410_s14  ;;  %s556_s14 = smov %s475_s21 }
 0x1ce   : > { %s557_s15 = smov %s464_s18  ;;  %15 = sbr.rel (!%p13_p3) target bundleno = 3 (0x3), region = 67 }
 0x1d5   :  { %250 = vsyncpa [#allocation3], 1 }
 0x1d6   :  { %252 = vsyncpa [#allocation3 + $0x1], 1 }

</bundles_post_ra>
